<compile_context>
chip_gen: v5e
topology: v5e:2x2
jax: 0.10.0
libtpu: 0.0.40
codegen_flags: <defaults>
</compile_context>

<pallas_src>
from functools import partial

import jax
import jax.numpy as jnp
import numpy as np
from jax.experimental import pallas as pl
from jax.experimental.pallas import tpu as pltpu

GEM_EPS = 1e-6
_MEAN_FLOOR = 1e-30          # guards the 1/p root against f32 underflow
_BLOCK_BUDGET = 6 << 20      # f32 bytes per pipelined input block
_VMEM_LIMIT = 40 << 20       # covers 2x input block + elementwise temporaries


# --------------------------------------------------------------------------
# Kernels.  Blocks are (tile_r, H*W): rows = (n, c) pairs on the sublane axis,
# the full spatial extent contiguous on the lane axis.
# --------------------------------------------------------------------------
def _gem_kernel_static_p(x_ref, o_ref, *, p, eps):
    hw = x_ref.shape[1]
    x = x_ref[...].astype(jnp.float32)
    xc = jnp.maximum(x, eps)
    xp = xc ** p                                   # integer p -> VPU multiplies
    mean = jnp.sum(xp, axis=1, keepdims=True) * (1.0 / hw)   # (tile_r, 1)
    mean = jnp.maximum(mean, _MEAN_FLOOR)
    o_ref[...] = (mean ** (1.0 / p)).astype(o_ref.dtype)     # tiny per-row pow


def _gem_kernel_dyn_p(p_ref, x_ref, o_ref, *, eps):
    hw = x_ref.shape[1]
    p = p_ref[0]                                   # scalar-prefetched in SMEM
    x = x_ref[...].astype(jnp.float32)
    # clamp + pow fused; pow(x, p) = exp(p * log(x)) (x >= eps > 0)
    xp = jnp.exp(p * jnp.log(jnp.maximum(x, eps)))
    mean = jnp.sum(xp, axis=1, keepdims=True) * (1.0 / hw)
    mean = jnp.maximum(mean, _MEAN_FLOOR)
    o_ref[...] = jnp.exp(jnp.log(mean) / p).astype(o_ref.dtype)


# --------------------------------------------------------------------------
# Tiling.
# --------------------------------------------------------------------------
def _round_up(x, m):
    return (x + m - 1) // m * m


def _pick_tile_rows(rows, hw):
    """Rows (= (n,c) pairs) per block: multiple of 8, bounded VMEM footprint."""
    if rows < 8:
        return rows                                # full extent: layout-legal
    per_row = hw * 4                               # budget measured in f32
    max_rows = max(8, (_BLOCK_BUDGET // per_row) // 8 * 8)
    tile_r = min(max_rows, _round_up(rows, 8))
    # v7x megacore: make sure the (parallel) grid has >= 2 blocks when possible.
    if tile_r >= rows and rows > 8:
        tile_r = max(8, _round_up(pl.cdiv(rows, 2), 8))
    return tile_r


def _static_int_p(p):
    """Return p as a Python int if it is a compile-time integer, else None."""
    if isinstance(p, bool):
        return None
    if isinstance(p, int):
        return p if 1 <= p <= 16 else None
    if isinstance(p, float) and float(p).is_integer():
        pi = int(p)
        return pi if 1 <= pi <= 16 else None
    return None


# --------------------------------------------------------------------------
# Wrapper.
# --------------------------------------------------------------------------
def gem_pallas(x_nchw, p=3, eps=GEM_EPS):
    """GeM pooling. x_nchw: (N, C, H, W). Returns (N, C, 1, 1) like PyTorch."""
    N, C, H, W = x_nchw.shape
    rows, hw = N * C, H * W
    # Free reshape (NCHW is contiguous); no HBM transpose.
    x2d = x_nchw.reshape(rows, hw)

    tile_r = _pick_tile_rows(rows, hw)
    grid = (pl.cdiv(rows, tile_r),)
    out_shape = jax.ShapeDtypeStruct((rows, 1), x_nchw.dtype)
    cparams = pltpu.CompilerParams(
        dimension_semantics=("parallel",),
        vmem_limit_bytes=_VMEM_LIMIT,
    )

    p_static = _static_int_p(p)
    if p_static is not None:
        # Fast path: x^p via repeated VPU multiplies, no per-element EUP work.
        out = pl.pallas_call(
            partial(_gem_kernel_static_p, p=p_static, eps=float(eps)),
            out_shape=out_shape,
            grid_spec=pltpu.PrefetchScalarGridSpec(
                num_scalar_prefetch=0,
                grid=grid,
                in_specs=[pl.BlockSpec((tile_r, hw), lambda r: (r, 0))],
                out_specs=pl.BlockSpec((tile_r, 1), lambda r: (r, 0)),
            ),
            compiler_params=cparams,
        )(x2d)
    else:
        # Dynamic (learnable / traced) p: scalar-prefetched into SMEM.
        p_arr = jnp.asarray(p, jnp.float32).reshape((1,))
        out = pl.pallas_call(
            partial(_gem_kernel_dyn_p, eps=float(eps)),
            out_shape=out_shape,
            grid_spec=pltpu.PrefetchScalarGridSpec(
                num_scalar_prefetch=1,
                grid=grid,
                in_specs=[pl.BlockSpec((tile_r, hw), lambda r, p_s: (r, 0))],
                out_specs=pl.BlockSpec((tile_r, 1), lambda r, p_s: (r, 0)),
            ),
            compiler_params=cparams,
        )(p_arr, x2d)

    return out.reshape(N, C, 1, 1)


def gem_reference(x_nchw, p, eps=GEM_EPS):
    """Pure-JAX reference mirroring the PyTorch GeM module."""
    xc = jnp.maximum(x_nchw.astype(jnp.float32), eps)
    pooled = jnp.mean(xc ** p, axis=(2, 3), keepdims=True)
    return (pooled ** (1.0 / p)).astype(x_nchw.dtype)


if __name__ == "__main__":
    key = jax.random.PRNGKey(0)
    k1, k2 = jax.random.split(key)

    # --- small shape, module default p=3 (static integer fast path) ---------
    x_small = jax.random.normal(k1, (2, 4, 16, 16), jnp.float32)
    out_small = jax.block_until_ready(gem_pallas(x_small, p=3))
    ref_small = jax.block_until_ready(gem_reference(x_small, 3.0))
    np.testing.assert_allclose(np.asarray(out_small), np.asarray(ref_small),
                               rtol=1e-4, atol=1e-6)

    # --- larger shape, dynamic non-integer p (scalar-prefetch path, multi-
    #     block grid with a partial trailing block) --------------------------
    p_dyn = jnp.float32(2.5)
    x_big = jax.random.normal(k2, (16, 384, 24, 24), jnp.float32)
    out_big = jax.block_until_ready(gem_pallas(x_big, p=p_dyn))
    ref_big = jax.block_until_ready(gem_reference(x_big, p_dyn))
    np.testing.assert_allclose(np.asarray(out_big), np.asarray(ref_big),
                               rtol=1e-4, atol=1e-6)

    print("KERNEL_OK")
</pallas_src>

<mosaic_0001>
module attributes {stable_mosaic.version = 11 : i64} {
  func.func @_gem_kernel_static_p(%arg0: i32, %arg1: memref<8x256xf32, #tpu.memory_space<vmem>>, %arg2: memref<8x1xf32, #tpu.memory_space<vmem>>) attributes {dimension_semantics = [#tpu.dimension_semantics<parallel>], iteration_bounds = array<i64: 1>, scalar_prefetch = 0 : i64, scratch_operands = 0 : i64, tpu.core_type = #tpu.core_type<tc>, window_params = [{transform_indices = @transform_0, window_bounds = array<i64: 8, 256>}, {transform_indices = @transform_1, window_bounds = array<i64: 8, 1>}]} {
    %c0 = arith.constant 0 : index
    %c0_0 = arith.constant 0 : index
    %0 = vector.load %arg1[%c0, %c0_0] : memref<8x256xf32, #tpu.memory_space<vmem>>, vector<8x256xf32>
    %cst = arith.constant 9.99999997E-7 : f32
    %1 = vector.broadcast %cst : f32 to vector<8x256xf32>
    %2 = arith.maximumf %0, %1 : vector<8x256xf32>
    %3 = arith.mulf %2, %2 : vector<8x256xf32>
    %4 = arith.mulf %2, %3 : vector<8x256xf32>
    %cst_1 = arith.constant dense<0.000000e+00> : vector<8xf32>
    %5 = vector.multi_reduction <add>, %4, %cst_1 [1] : vector<8x256xf32> to vector<8xf32>
    %6 = vector.shape_cast %5 : vector<8xf32> to vector<8x1xf32>
    %cst_2 = arith.constant 3.906250e-03 : f32
    %7 = vector.broadcast %cst_2 : f32 to vector<8x1xf32>
    %8 = arith.mulf %6, %7 : vector<8x1xf32>
    %cst_3 = arith.constant 1.000000e-30 : f32
    %9 = vector.broadcast %cst_3 : f32 to vector<8x1xf32>
    %10 = arith.maximumf %8, %9 : vector<8x1xf32>
    %cst_4 = arith.constant 0.333333343 : f32
    %11 = vector.broadcast %cst_4 : f32 to vector<8x1xf32>
    %12 = math.powf %10, %11 : vector<8x1xf32>
    %c0_5 = arith.constant 0 : index
    %c0_6 = arith.constant 0 : index
    %13 = vector.load %arg2[%c0_5, %c0_6] : memref<8x1xf32, #tpu.memory_space<vmem>>, vector<8x1xf32>
    tpu.vector_store %arg2[%c0_5, %c0_6], %12 {strides = array<i32>} : memref<8x1xf32, #tpu.memory_space<vmem>>, vector<8x1xf32>,
    return
  }
  func.func @transform_0(%arg0: i32) -> (i32, i32) {
    %c0_i32 = arith.constant 0 : i32
    %c0_i32_0 = arith.constant 0 : i32
    return %arg0, %c0_i32 : i32, i32
  }
  func.func @transform_1(%arg0: i32) -> (i32, i32) {
    %c0_i32 = arith.constant 0 : i32
    %c0_i32_0 = arith.constant 0 : i32
    return %arg0, %c0_i32 : i32, i32
  }
}

</mosaic_0001>

<bundles_post_ra>
// kernel: tpu_custom_call.1
= control target key start
LH: loop header
LB: loop body
LE: loop exit
PB: predicated region body
PF: predicated region fallthrough
CT: control target
= control target key end

     0   :  { %6 = vsyncpa [#allocation3], 0  ;;  %s98_s9 = smov [#allocation2]   ;;  %s115_s0 = inlined_call_operand.hbm [shape: f32[8,256], index: 0, kind: input, shape index: {}]   ;;  %s116_s1 = inlined_call_operand.vmem [shape: f32[8,1], index: 1, kind: output, shape index: {}]  }
   0x1   :  { %s12_s8 = sshll.u32 %s115_s0, 4  ;;  %s14_s10 = sshll.u32 %s98_s9, 4  ;;  %s13_s8 = int_to_ptr.hbm [resolvable:$true] %s12_s8  ;;  %s15_s10 = int_to_ptr.vmem [resolvable:$true] %s14_s10 }
   0x2   :  { %17 = dma.hbm_to_vmem [thread:$0]  %s13_s8, 256, %s15_s10, [#allocation3]  }
   0x3   :  { %96 = dma.done.wait [#allocation3], 256  }
   0x4   :  { %97 = vsyncadd [#allocation3], 4294967040  ;;  %v22_v0 = vld [vmem:[#allocation2] sm:$0xff]  ;;  %v23_v1 = vld [vmem:[#allocation2 + $0x8] sm:$0xff]  ;;  %vm36_vm4 = vcmask 7168  }
   0x5   :  { %v24_v2 = vmax.f32 %v22_v0, 1e-06  ;;  %v25_v3 = vmax.f32 %v23_v1, 1e-06 }
   0x7   :  { %v26_v4 = vmul.f32 %v24_v2, %v24_v2  ;;  %v27_v5 = vmul.f32 %v25_v3, %v25_v3 }
   0x9   :  { %v28_v6 = vmul.f32 %v26_v4, %v24_v2  ;;  %v29_v7 = vmul.f32 %v27_v5, %v25_v3 }
   0xb   :  { %v30_v8 = vadd.f32 %v29_v7, %v28_v6 }
   0xd   :  { %31 = vadd.xlane.f32.xlu0 %v30_v8 }
  0x80   :  { %v32_v9 = vpop.xlane.xlu0 %31 }
  0x81   :  { %v33_v10 = vmul.f32 0.00390625, %v32_v9 }
  0x83   :  { %v34_v11 = vmax.f32 %v33_v10, 1e-30 }
  0x85   :  { %v45_v12 = vand.u32 2147483647, %v34_v11  ;;  %v62_v24 = vand.u32 2147483648, %v34_v11  ;;  %vm44_vm2 = vcmp.lt.f32.partialorder %v34_v11, 0.0  ;;  %vm43_vm3 = vcmp.eq.f32.partialorder %v34_v11, 0.0 }
  0x87   :  { %68 = vlog2.f32 %v45_v12  ;;  %vm59_vm0 = vweird.f32 %v45_v12  ;;  %vm61_vm1 = vcmp.eq.f32.partialorder %v45_v12, 0.0  ;;  %vm46_vm5 = vcmp.eq.f32.partialorder %v45_v12, inf }
  0x8d   :  { %v69_v13 = vpop.eup %68 }
  0x8e   :  { %v49_v14 = vmul.f32 -0.33333334, %v69_v13 }
  0x90   :  { %70 = vpow2.f32 %v49_v14 }
  0x96   :  { %v71_v15 = vpop.eup %70 }
  0x97   :  { %v51_v16 = vmul.f32 %v71_v15, %v71_v15 }
  0x99   :  { %v52_v17 = vmul.f32 %v51_v16, %v45_v12 }
  0x9b   :  { %v53_v18 = vmul.f32 %v52_v17, %v51_v16 }
  0x9d   :  { %v54_v19 = vsub.f32 %v53_v18, %v71_v15 }
  0x9f   :  { %v55_v20 = vmul.f32 -0.33333334, %v54_v19 }
  0xa1   :  { %v56_v21 = vadd.f32 %v71_v15, %v55_v20 }
  0xa3   :  { %v57_v22 = vmul.f32 %v56_v21, %v34_v11 }
  0xa5   :  { %v58_v23 = vmul.f32 %v57_v22, %v56_v21 }
  0xa7   :  { %v60_v25 = vsel %vm59_vm0, %v34_v11, %v58_v23 }
  0xa8   :  { %v63_v26 = vsel %vm61_vm1, %v62_v24, %v60_v25 }
  0xa9   :  { %v64_v27 = vsel %vm44_vm2, nan, %v63_v26 }
  0xaa   :  { %v65_v28 = vsel %vm43_vm3, 0.0, %v64_v27 }
  0xab   :  { %v66_v29 = vsel %vm46_vm5, inf, %v65_v28 }
  0xac   :  { %37 = vst.msk [vmem:[%s116_s1] sm:$0xff] %vm36_vm4, %v66_v29 }
  0xad   :  { %42 = vsyncpa [#allocation3], 1 }

</bundles_post_ra>
